<compile_context>
chip_gen: v5e
topology: v5e:2x2
jax: 0.10.0
libtpu: 0.0.40
codegen_flags: <defaults>
</compile_context>

<pallas_src>
import jax
import jax.numpy as jnp
from jax.experimental import pallas as pl
from jax.experimental.pallas import tpu as pltpu

LN_EPS = 1e-5  # PyTorch nn.LayerNorm default


# ----------------------------- DurationPredictor kernel ---------------------
def _dp_kernel(xpad_ref, w1_ref, w2_ref, vecs_ref, out_ref):
    T = out_ref.shape[2]
    xp = xpad_ref[0]                                   # (T+2, D)

    vecs = vecs_ref[...]                               # (8, F) packed vectors
    b1, g1, be1 = vecs[0:1], vecs[1:2], vecs[2:3]
    b2, g2, be2 = vecs[3:4], vecs[4:5], vecs[5:6]
    wl = vecs[6:7]                                     # (1, F) linear weight
    bl = vecs[7:8, 0:1]                                # (1, 1) linear bias

    # Conv1d #1 (kernel=3, padding=1) as one im2col matmul: (T,3D) @ (3D,F).
    xcol = jnp.concatenate([xp[0:T, :], xp[1:T + 1, :], xp[2:T + 2, :]], axis=1)
    h = jnp.dot(xcol, w1_ref[...], preferred_element_type=jnp.float32) + b1

    # LayerNorm over channels + ReLU (kept in f32; no bf16 VPU on v5e).
    mu = jnp.mean(h, axis=-1, keepdims=True)
    var = jnp.mean((h - mu) ** 2, axis=-1, keepdims=True)
    h = jnp.maximum((h - mu) * jax.lax.rsqrt(var + LN_EPS) * g1 + be1, 0.0)
    # TODO(synk): nn.Dropout treated as identity (eval semantics; stochastic op).

    # Conv1d #2: build shifted copies of h directly (no VMEM scratch round-trip),
    # then one im2col matmul: (T,3F) @ (3F,F).
    F_ = h.shape[1]
    zrow = jnp.zeros((1, F_), jnp.float32)
    h_prev = jnp.concatenate([zrow, h[:-1, :]], axis=0)   # h[t-1] with zero pad
    h_next = jnp.concatenate([h[1:, :], zrow], axis=0)    # h[t+1] with zero pad
    hcol = jnp.concatenate([h_prev, h, h_next], axis=1)   # (T, 3F)
    h2 = jnp.dot(hcol, w2_ref[...], preferred_element_type=jnp.float32) + b2

    mu2 = jnp.mean(h2, axis=-1, keepdims=True)
    var2 = jnp.mean((h2 - mu2) ** 2, axis=-1, keepdims=True)
    h2 = jnp.maximum((h2 - mu2) * jax.lax.rsqrt(var2 + LN_EPS) * g2 + be2, 0.0)

    # Linear(F -> 1) + ReLU, produced directly as a lane-dense (1, T) row
    # (contraction over the channel dim of both operands -> no width-1 store).
    dur_row = jax.lax.dot_general(
        wl, h2, (((1,), (1,)), ((), ())),
        preferred_element_type=jnp.float32) + bl           # (1, T)
    out_ref[0] = jnp.maximum(dur_row, 0.0)


def duration_predictor(x, p):
    B, T, D = x.shape
    F_ = p["w1"].shape[2]

    xpad = jnp.pad(x, ((0, 0), (1, 1), (0, 0)))             # time padding for conv
    w1col = p["w1"].reshape(3 * D, F_)                      # im2col weights
    w2col = p["w2"].reshape(3 * F_, F_)
    # Pack the 7 per-channel vectors + linear weight into a single (8, F) tile.
    vecs = jnp.concatenate(
        [p["b1"], p["g1"], p["be1"], p["b2"], p["g2"], p["be2"],
         p["wl"].reshape(1, F_), jnp.broadcast_to(p["bl"], (1, F_))], axis=0)

    out = pl.pallas_call(
        _dp_kernel,
        out_shape=jax.ShapeDtypeStruct((B, 1, T), jnp.float32),
        grid_spec=pltpu.PrefetchScalarGridSpec(
            num_scalar_prefetch=0,
            grid=(B,),
            in_specs=[
                pl.BlockSpec((1, T + 2, D), lambda b: (b, 0, 0)),
                pl.BlockSpec((3 * D, F_), lambda b: (0, 0)),
                pl.BlockSpec((3 * F_, F_), lambda b: (0, 0)),
                pl.BlockSpec((8, F_), lambda b: (0, 0)),
            ],
            out_specs=pl.BlockSpec((1, 1, T), lambda b: (b, 0, 0)),
        ),
        compiler_params=pltpu.CompilerParams(
            dimension_semantics=("parallel",)),
    )(xpad, w1col, w2col, vecs)
    # matches `out.squeeze()` in training mode (B > 1): shape (B, T)
    return out[:, 0, :]


# ----------------------------- LR (alignment @ x) kernel --------------------
def _lr_kernel(totals_ref, bounds_ref, x_ref, out_ref):
    tm_ = out_ref.shape[1]
    T = x_ref.shape[1]
    b = pl.program_id(0)
    tile_start = pl.program_id(1) * tm_

    # Skip mel tiles that are entirely past sum(durations[b]) — they are all
    # zero padding (still must be stored as zeros; output HBM is uninitialized).
    valid = tile_start < totals_ref[b]

    @pl.when(valid)
    def _():
        bnds = bounds_ref[0]                               # (2, T) int32
        start = bnds[0:1, :] - tile_start                  # (1, T)
        end = bnds[1:2, :] - tile_start                    # (1, T)
        # alignment[t, j] = 1  iff  start[j] <= t + tile_start < end[j]
        t_idx = jax.lax.broadcasted_iota(jnp.int32, (tm_, T), 0)
        align = jnp.where((t_idx >= start) & (t_idx < end), 1.0, 0.0)
        out_ref[0] = jnp.dot(align, x_ref[0],
                             preferred_element_type=jnp.float32
                             ).astype(out_ref.dtype)

    @pl.when(jnp.logical_not(valid))
    def _():
        out_ref[...] = jnp.zeros_like(out_ref)


def _pick_mel_tile(M, pref):
    """Largest tile <= pref that divides M and satisfies the (8,128) rule."""
    if M <= pref:
        return M
    start = max(8, pref - pref % 8)
    for t in range(start, 7, -8):
        if M % t == 0:
            return t
    return M


def length_regulate(x, durations, mel_max_length, *, tm=512):
    # Precondition (same as before / as the clipped PyTorch-pad path):
    # max_b sum(durations[b]) <= mel_max_length, otherwise extra frames are dropped.
    B, T, D = x.shape
    M = int(mel_max_length)
    tm = _pick_mel_tile(M, tm)
    Mt = M // tm

    dur_i = durations.astype(jnp.int32)
    end = jnp.cumsum(dur_i, axis=-1)                       # int32 prefix sums
    start = end - dur_i
    bounds = jnp.stack([start, end], axis=1)               # (B, 2, T) int32
    totals = end[:, -1]                                    # (B,) int32

    out = pl.pallas_call(
        _lr_kernel,
        out_shape=jax.ShapeDtypeStruct((B, M, D), x.dtype),
        grid_spec=pltpu.PrefetchScalarGridSpec(
            num_scalar_prefetch=1,                         # totals -> SMEM
            grid=(B, Mt),
            in_specs=[
                pl.BlockSpec((1, 2, T), lambda b, m, tot: (b, 0, 0)),
                pl.BlockSpec((1, T, D), lambda b, m, tot: (b, 0, 0)),
            ],
            out_specs=pl.BlockSpec((1, tm, D), lambda b, m, tot: (b, m, 0)),
        ),
        compiler_params=pltpu.CompilerParams(
            dimension_semantics=("parallel", "arbitrary"),
            vmem_limit_bytes=32 * 1024 * 1024),
    )(totals, bounds, x)
    return out


# ----------------------------- LengthRegulator forward ----------------------
def length_regulator_forward(x, params, target, mel_max_length):
    """Training-path forward (target provided):
       returns (expanded_output (B, mel_max_length, D), duration_pred (B, T))."""
    dur_pred = duration_predictor(x, params)
    output = length_regulate(x, target, mel_max_length)
    return output, dur_pred
    # TODO(synk): inference branch (alpha-scaled rounding, data-dependent
    # expand_max_len, mel_pos) needs dynamic output shapes; not implemented.


# ----------------------------- parameter init -------------------------------
def init_params(key, D, F_):
    ks = jax.random.split(key, 6)
    s = 0.1
    return dict(
        # w*[k] corresponds to Conv1d.weight[:, :, k].T  -> shape (C_in, C_out)
        w1=jax.random.normal(ks[0], (3, D, F_), jnp.float32) * s,
        b1=jax.random.normal(ks[1], (1, F_), jnp.float32) * s,
        g1=jnp.ones((1, F_), jnp.float32),
        be1=jnp.zeros((1, F_), jnp.float32),
        w2=jax.random.normal(ks[2], (3, F_, F_), jnp.float32) * s,
        b2=jax.random.normal(ks[3], (1, F_), jnp.float32) * s,
        g2=jnp.ones((1, F_), jnp.float32),
        be2=jnp.zeros((1, F_), jnp.float32),
        wl=jax.random.normal(ks[4], (F_, 1), jnp.float32) * s,
        bl=jax.random.normal(ks[5], (1, 1), jnp.float32) * s,
    )


# ----------------------------- pure-JAX reference ---------------------------
def _dp_ref(x, p):
    B, T, D = x.shape
    xpad = jnp.pad(x, ((0, 0), (1, 1), (0, 0)))
    def conv(xp, w, b):
        return (xp[:, 0:T] @ w[0] + xp[:, 1:T + 1] @ w[1] + xp[:, 2:T + 2] @ w[2] + b)
    def ln_relu(h, g, be):
        mu = h.mean(-1, keepdims=True)
        var = ((h - mu) ** 2).mean(-1, keepdims=True)
        return jnp.maximum((h - mu) * jax.lax.rsqrt(var + LN_EPS) * g + be, 0.0)
    h = ln_relu(conv(xpad, p["w1"], p["b1"]), p["g1"], p["be1"])
    hpad = jnp.pad(h, ((0, 0), (1, 1), (0, 0)))
    h2 = ln_relu(conv(hpad, p["w2"], p["b2"]), p["g2"], p["be2"])
    return jnp.maximum(h2 @ p["wl"] + p["bl"], 0.0)[..., 0]


def _lr_ref(x, dur, M):
    dur = dur.astype(jnp.float32)
    end = jnp.cumsum(dur, axis=-1)
    start = end - dur
    t = jnp.arange(M, dtype=jnp.float32)[None, :, None]
    align = ((t >= start[:, None, :]) & (t < end[:, None, :])).astype(x.dtype)
    return jnp.einsum("bmt,btd->bmd", align, x)


# ----------------------------- main ------------------------------------------
if __name__ == "__main__":
    B, T, D, F_ = 2, 8, 32, 32
    MEL_MAX_LEN = 40

    key = jax.random.PRNGKey(0)
    kx, kd, kp = jax.random.split(key, 3)
    x = jax.random.normal(kx, (B, T, D), jnp.float32)
    target = jax.random.randint(kd, (B, T), 1, 5, jnp.int32)   # ground-truth durations
    params = init_params(kp, D, F_)

    out, dur_pred = length_regulator_forward(x, params, target, MEL_MAX_LEN)
    out = jax.block_until_ready(out)
    dur_pred = jax.block_until_ready(dur_pred)

    # correctness vs. pure-JAX reference
    ref_dur = _dp_ref(x, params)
    ref_out = _lr_ref(x, target, MEL_MAX_LEN)
    assert out.shape == (B, MEL_MAX_LEN, D) and dur_pred.shape == (B, T)
    assert jnp.allclose(dur_pred, ref_dur, atol=1e-4, rtol=1e-4)
    assert jnp.allclose(out, ref_out, atol=1e-4, rtol=1e-4)

    print("KERNEL_OK")
</pallas_src>

<mosaic_0001>
module attributes {stable_mosaic.version = 11 : i64} {
  func.func @_dp_kernel(%arg0: i32, %arg1: memref<1x10x32xf32, #tpu.memory_space<vmem>>, %arg2: memref<96x32xf32, #tpu.memory_space<vmem>>, %arg3: memref<96x32xf32, #tpu.memory_space<vmem>>, %arg4: memref<8x32xf32, #tpu.memory_space<vmem>>, %arg5: memref<1x1x8xf32, #tpu.memory_space<vmem>>) attributes {dimension_semantics = [#tpu.dimension_semantics<parallel>], iteration_bounds = array<i64: 2>, scalar_prefetch = 0 : i64, scratch_operands = 0 : i64, tpu.core_type = #tpu.core_type<tc>, window_params = [{transform_indices = @transform_0, window_bounds = array<i64: 1, 10, 32>}, {pipeline_mode = #tpu.pipeline_mode<synchronous>, transform_indices = @transform_1, window_bounds = array<i64: 96, 32>}, {pipeline_mode = #tpu.pipeline_mode<synchronous>, transform_indices = @transform_2, window_bounds = array<i64: 96, 32>}, {pipeline_mode = #tpu.pipeline_mode<synchronous>, transform_indices = @transform_3, window_bounds = array<i64: 8, 32>}, {transform_indices = @transform_4, window_bounds = array<i64: 1, 1, 8>}]} {
    %c0 = arith.constant 0 : index
    %c0_0 = arith.constant 0 : index
    %c0_1 = arith.constant 0 : index
    %0 = vector.load %arg1[%c0, %c0_0, %c0_1] : memref<1x10x32xf32, #tpu.memory_space<vmem>>, vector<1x10x32xf32>
    %1 = vector.shape_cast %0 : vector<1x10x32xf32> to vector<10x32xf32>
    %c0_2 = arith.constant 0 : index
    %c0_3 = arith.constant 0 : index
    %2 = vector.load %arg4[%c0_2, %c0_3] : memref<8x32xf32, #tpu.memory_space<vmem>>, vector<8x32xf32>
    %3 = vector.extract_strided_slice %2 {offsets = [0, 0], sizes = [1, 32], strides = [1, 1]} : vector<8x32xf32> to vector<1x32xf32>
    %4 = vector.extract_strided_slice %2 {offsets = [1, 0], sizes = [1, 32], strides = [1, 1]} : vector<8x32xf32> to vector<1x32xf32>
    %5 = vector.extract_strided_slice %2 {offsets = [2, 0], sizes = [1, 32], strides = [1, 1]} : vector<8x32xf32> to vector<1x32xf32>
    %6 = vector.extract_strided_slice %2 {offsets = [3, 0], sizes = [1, 32], strides = [1, 1]} : vector<8x32xf32> to vector<1x32xf32>
    %7 = vector.extract_strided_slice %2 {offsets = [4, 0], sizes = [1, 32], strides = [1, 1]} : vector<8x32xf32> to vector<1x32xf32>
    %8 = vector.extract_strided_slice %2 {offsets = [5, 0], sizes = [1, 32], strides = [1, 1]} : vector<8x32xf32> to vector<1x32xf32>
    %9 = vector.extract_strided_slice %2 {offsets = [6, 0], sizes = [1, 32], strides = [1, 1]} : vector<8x32xf32> to vector<1x32xf32>
    %10 = vector.extract_strided_slice %2 {offsets = [7, 0], sizes = [1, 1], strides = [1, 1]} : vector<8x32xf32> to vector<1x1xf32>
    %11 = vector.extract_strided_slice %1 {offsets = [0, 0], sizes = [8, 32], strides = [1, 1]} : vector<10x32xf32> to vector<8x32xf32>
    %12 = vector.extract_strided_slice %1 {offsets = [1, 0], sizes = [8, 32], strides = [1, 1]} : vector<10x32xf32> to vector<8x32xf32>
    %13 = vector.extract_strided_slice %1 {offsets = [2, 0], sizes = [8, 32], strides = [1, 1]} : vector<10x32xf32> to vector<8x32xf32>
    %14 = tpu.concatenate %11, %12, %13 in 1 : vector<8x32xf32>, vector<8x32xf32>, vector<8x32xf32> -> vector<8x96xf32>
    %c0_4 = arith.constant 0 : index
    %c0_5 = arith.constant 0 : index
    %15 = vector.load %arg2[%c0_4, %c0_5] : memref<96x32xf32, #tpu.memory_space<vmem>>, vector<96x32xf32>
    %cst = arith.constant dense<0.000000e+00> : vector<8x32xf32>
    %16 = tpu.matmul %14, %15, %cst {dimension_numbers = #tpu.dot_dimension_numbers<[1], [0], [0], [1], [0, 0, 1, 1], [], []>} : vector<8x96xf32>, vector<96x32xf32>, vector<8x32xf32> -> vector<8x32xf32>
    %17 = vector.broadcast %3 : vector<1x32xf32> to vector<8x32xf32>
    %18 = arith.addf %16, %17 : vector<8x32xf32>
    %cst_6 = arith.constant dense<0.000000e+00> : vector<8xf32>
    %19 = vector.multi_reduction <add>, %18, %cst_6 [1] : vector<8x32xf32> to vector<8xf32>
    %20 = vector.shape_cast %19 : vector<8xf32> to vector<8x1xf32>
    %cst_7 = arith.constant 3.200000e+01 : f32
    %21 = vector.broadcast %cst_7 : f32 to vector<8x1xf32>
    %22 = arith.divf %20, %21 : vector<8x1xf32>
    %23 = vector.broadcast %22 : vector<8x1xf32> to vector<8x32xf32>
    %24 = arith.subf %18, %23 : vector<8x32xf32>
    %25 = arith.mulf %24, %24 : vector<8x32xf32>
    %cst_8 = arith.constant dense<0.000000e+00> : vector<8xf32>
    %26 = vector.multi_reduction <add>, %25, %cst_8 [1] : vector<8x32xf32> to vector<8xf32>
    %27 = vector.shape_cast %26 : vector<8xf32> to vector<8x1xf32>
    %cst_9 = arith.constant 3.200000e+01 : f32
    %28 = vector.broadcast %cst_9 : f32 to vector<8x1xf32>
    %29 = arith.divf %27, %28 : vector<8x1xf32>
    %30 = vector.broadcast %22 : vector<8x1xf32> to vector<8x32xf32>
    %31 = arith.subf %18, %30 : vector<8x32xf32>
    %cst_10 = arith.constant 9.99999974E-6 : f32
    %32 = vector.broadcast %cst_10 : f32 to vector<8x1xf32>
    %33 = arith.addf %29, %32 : vector<8x1xf32>
    %34 = math.rsqrt %33 : vector<8x1xf32>
    %35 = vector.broadcast %34 : vector<8x1xf32> to vector<8x32xf32>
    %36 = arith.mulf %31, %35 : vector<8x32xf32>
    %37 = vector.broadcast %4 : vector<1x32xf32> to vector<8x32xf32>
    %38 = arith.mulf %36, %37 : vector<8x32xf32>
    %39 = vector.broadcast %5 : vector<1x32xf32> to vector<8x32xf32>
    %40 = arith.addf %38, %39 : vector<8x32xf32>
    %cst_11 = arith.constant 0.000000e+00 : f32
    %41 = vector.broadcast %cst_11 : f32 to vector<8x32xf32>
    %42 = arith.maximumf %40, %41 : vector<8x32xf32>
    %cst_12 = arith.constant 0.000000e+00 : f32
    %43 = vector.broadcast %cst_12 : f32 to vector<1x32xf32>
    %44 = vector.extract_strided_slice %42 {offsets = [0, 0], sizes = [7, 32], strides = [1, 1]} : vector<8x32xf32> to vector<7x32xf32>
    %45 = tpu.concatenate %43, %44 in 0 : vector<1x32xf32>, vector<7x32xf32> -> vector<8x32xf32>
    %46 = vector.extract_strided_slice %42 {offsets = [1, 0], sizes = [7, 32], strides = [1, 1]} : vector<8x32xf32> to vector<7x32xf32>
    %47 = tpu.concatenate %46, %43 in 0 : vector<7x32xf32>, vector<1x32xf32> -> vector<8x32xf32>
    %48 = tpu.concatenate %45, %42, %47 in 1 : vector<8x32xf32>, vector<8x32xf32>, vector<8x32xf32> -> vector<8x96xf32>
    %c0_13 = arith.constant 0 : index
    %c0_14 = arith.constant 0 : index
    %49 = vector.load %arg3[%c0_13, %c0_14] : memref<96x32xf32, #tpu.memory_space<vmem>>, vector<96x32xf32>
    %cst_15 = arith.constant dense<0.000000e+00> : vector<8x32xf32>
    %50 = tpu.matmul %48, %49, %cst_15 {dimension_numbers = #tpu.dot_dimension_numbers<[1], [0], [0], [1], [0, 0, 1, 1], [], []>} : vector<8x96xf32>, vector<96x32xf32>, vector<8x32xf32> -> vector<8x32xf32>
    %51 = vector.broadcast %6 : vector<1x32xf32> to vector<8x32xf32>
    %52 = arith.addf %50, %51 : vector<8x32xf32>
    %cst_16 = arith.constant dense<0.000000e+00> : vector<8xf32>
    %53 = vector.multi_reduction <add>, %52, %cst_16 [1] : vector<8x32xf32> to vector<8xf32>
    %54 = vector.shape_cast %53 : vector<8xf32> to vector<8x1xf32>
    %cst_17 = arith.constant 3.200000e+01 : f32
    %55 = vector.broadcast %cst_17 : f32 to vector<8x1xf32>
    %56 = arith.divf %54, %55 : vector<8x1xf32>
    %57 = vector.broadcast %56 : vector<8x1xf32> to vector<8x32xf32>
    %58 = arith.subf %52, %57 : vector<8x32xf32>
    %59 = arith.mulf %58, %58 : vector<8x32xf32>
    %cst_18 = arith.constant dense<0.000000e+00> : vector<8xf32>
    %60 = vector.multi_reduction <add>, %59, %cst_18 [1] : vector<8x32xf32> to vector<8xf32>
    %61 = vector.shape_cast %60 : vector<8xf32> to vector<8x1xf32>
    %cst_19 = arith.constant 3.200000e+01 : f32
    %62 = vector.broadcast %cst_19 : f32 to vector<8x1xf32>
    %63 = arith.divf %61, %62 : vector<8x1xf32>
    %64 = vector.broadcast %56 : vector<8x1xf32> to vector<8x32xf32>
    %65 = arith.subf %52, %64 : vector<8x32xf32>
    %cst_20 = arith.constant 9.99999974E-6 : f32
    %66 = vector.broadcast %cst_20 : f32 to vector<8x1xf32>
    %67 = arith.addf %63, %66 : vector<8x1xf32>
    %68 = math.rsqrt %67 : vector<8x1xf32>
    %69 = vector.broadcast %68 : vector<8x1xf32> to vector<8x32xf32>
    %70 = arith.mulf %65, %69 : vector<8x32xf32>
    %71 = vector.broadcast %7 : vector<1x32xf32> to vector<8x32xf32>
    %72 = arith.mulf %70, %71 : vector<8x32xf32>
    %73 = vector.broadcast %8 : vector<1x32xf32> to vector<8x32xf32>
    %74 = arith.addf %72, %73 : vector<8x32xf32>
    %cst_21 = arith.constant 0.000000e+00 : f32
    %75 = vector.broadcast %cst_21 : f32 to vector<8x32xf32>
    %76 = arith.maximumf %74, %75 : vector<8x32xf32>
    %cst_22 = arith.constant dense<0.000000e+00> : vector<1x8xf32>
    %77 = tpu.matmul %9, %76, %cst_22 {dimension_numbers = #tpu.dot_dimension_numbers<[1], [1], [0], [0], [0, 0, 1, 0], [], []>} : vector<1x32xf32>, vector<8x32xf32>, vector<1x8xf32> -> vector<1x8xf32>
    %78 = vector.broadcast %10 : vector<1x1xf32> to vector<1x8xf32>
    %79 = arith.addf %77, %78 : vector<1x8xf32>
    %cst_23 = arith.constant 0.000000e+00 : f32
    %80 = vector.broadcast %cst_23 : f32 to vector<1x8xf32>
    %81 = arith.maximumf %79, %80 : vector<1x8xf32>
    %c0_24 = arith.constant 0 : index
    %c0_25 = arith.constant 0 : index
    %c0_26 = arith.constant 0 : index
    %82 = vector.load %arg5[%c0_24, %c0_25, %c0_26] : memref<1x1x8xf32, #tpu.memory_space<vmem>>, vector<1x1x8xf32>
    %83 = vector.shape_cast %82 : vector<1x1x8xf32> to vector<1x8xf32>
    %84 = vector.shape_cast %81 : vector<1x8xf32> to vector<1x1x8xf32>
    tpu.vector_store %arg5[%c0_24, %c0_25, %c0_26], %84 {strides = array<i32>} : memref<1x1x8xf32, #tpu.memory_space<vmem>>, vector<1x1x8xf32>,
    return
  }
  func.func @transform_0(%arg0: i32) -> (i32, i32, i32) {
    %c0_i32 = arith.constant 0 : i32
    %c0_i32_0 = arith.constant 0 : i32
    %c0_i32_1 = arith.constant 0 : i32
    return %arg0, %c0_i32, %c0_i32_0 : i32, i32, i32
  }
  func.func @transform_1(%arg0: i32) -> (i32, i32) {
    %c0_i32 = arith.constant 0 : i32
    %c0_i32_0 = arith.constant 0 : i32
    %c0_i32_1 = arith.constant 0 : i32
    return %c0_i32, %c0_i32_0 : i32, i32
  }
  func.func @transform_2(%arg0: i32) -> (i32, i32) {
    %c0_i32 = arith.constant 0 : i32
    %c0_i32_0 = arith.constant 0 : i32
    %c0_i32_1 = arith.constant 0 : i32
    return %c0_i32, %c0_i32_0 : i32, i32
  }
  func.func @transform_3(%arg0: i32) -> (i32, i32) {
    %c0_i32 = arith.constant 0 : i32
    %c0_i32_0 = arith.constant 0 : i32
    %c0_i32_1 = arith.constant 0 : i32
    return %c0_i32, %c0_i32_0 : i32, i32
  }
  func.func @transform_4(%arg0: i32) -> (i32, i32, i32) {
    %c0_i32 = arith.constant 0 : i32
    %c0_i32_0 = arith.constant 0 : i32
    %c0_i32_1 = arith.constant 0 : i32
    return %arg0, %c0_i32, %c0_i32_0 : i32, i32, i32
  }
}

</mosaic_0001>

<bundles_post_ra>
// kernel: tpu_custom_call.1
= control target key start
LH: loop header
LB: loop body
LE: loop exit
PB: predicated region body
PF: predicated region fallthrough
CT: control target
= control target key end

     0   :  { %9 = vsyncpa [#allocation3], 0  ;;  %s823_s0 = inlined_call_operand.vmem [shape: f32[2,10,32], index: 0, kind: input, shape index: {}]   ;;  %s824_s1 = inlined_call_operand.vmem [shape: f32[96,32], index: 1, kind: input, shape index: {}]   ;;  %s825_s2 = inlined_call_operand.vmem [shape: f32[96,32], index: 2, kind: input, shape index: {}]   ;;  %s826_s3 = inlined_call_operand.vmem [shape: f32[8,32], index: 3, kind: input, shape index: {}]   ;;  %s827_s4 = inlined_call_operand.hbm [shape: f32[2,1,8], index: 4, kind: output, shape index: {}]  }
   0x1   :  { %11 = vsyncpa [#allocation3 + $0x1], 0  ;;  %s629_s15 = smov 0   ;;  %s631_s16 = smov 0  }
   0x2   :  { %s633_s17 = smov 0   ;;  %s635_s18 = smov 0  }
   0x3 LB: > { %s650_s19 = sadd.s32 4294967295, %s598_s18   ;;  %s472_s20 = sadd.s32 4294967294, %s598_s18   ;;  %s598_s18 = sphi %s635_s18, %s833_s18   ;;  %s594_s17 = sphi %s633_s17, %s832_s17   ;;  %s590_s16 = sphi %s631_s16, %s831_s16   ;;  %s586_s15 = sphi %s629_s15, %s830_s15  }
   0x4   : > { %s654_s21 = sadd.s32 1, %s598_s18   ;;  %s113_s22 = sadd.s32 1, %s594_s17 }
   0x5   : > { %s110_s23 = ssub.s32 %s598_s18, %s654_s21  ;;  %p123_p0 = scmp.ne.s32.totalorder %s594_s17, %s590_s16 }
   0x6   : > { %p111_p1 = scmp.eq.s32.totalorder %s110_s23, 0  ;;  %p124_p2 = scmp.eq.s32.totalorder %s650_s19, 1 }
   0x7   : > { %p129_p3 = scmp.ne.s32.totalorder %s590_s16, %s586_s15  ;;  %p130_p4 = scmp.eq.s32.totalorder %s472_s20, 1 }
   0x8   : > { %s665_s24 = scalar_select %p111_p1, %s594_s17, %s113_s22  }
   0x9   : > { %p667_p5 = por %p124_p2, %p123_p0  ;;  %p671_p6 = por %p130_p4, %p129_p3 }
   0xa   : > { %p475_p7 = scmp.ge.s32.totalorder %s598_s18, 1  ;;  %p165_p8 = scmp.lt.s32.totalorder %s598_s18, 3 }
   0xc   : > { %p166_p9 = pnand %p475_p7, %p165_p8 }
   0xd   : > { %p190_p10 = scmp.lt.s32.totalorder (!%p166_p9), %s650_s19, 1  ;;  %s600_s27 = smov (!%p166_p9), 32  }
   0xe   : > { %169 = sbr.rel (%p166_p9) target bundleno = 1189 (0x4a5), region = 36  ;;  %s601_s30 = smov (!%p166_p9), 64  }
   0xf   : > { %s188_s9 = sand.u32 (!%p166_p9), 1, %s590_s16   ;;  %s413_s12 = scalar_lea.hbm (!%p166_p9), %s827_s4, %s650_s19 }
  0x10   : > { %s417_s20 = sshll.u32 (!%p166_p9), %s413_s12, 4  ;;  %s405_s22 = scalar_lea.sflag (!%p166_p9), [#allocation3], %s188_s9  ;;  %s418_s20 = int_to_ptr.hbm [resolvable:$true] %s417_s20 }
  0x11   : > { %s550_s23 = sshra.s32 (!%p166_p9), %s418_s20, 4  ;;  %s551_s23 = int_to_ptr.hbm [resolvable:$true] %s550_s23 }
  0x12   : > { %s552_s28 = scalar_lea.hbm (!%p166_p9), %s551_s23, 1  ;;  %p557_p0 = scmp.lt.s32.totalorder (!%p166_p9), %s551_s23, %s827_s4 }
  0x13   : > { %v229_v0 = vld [vmem:[%s824_s1 + $0x58] sm:$0xff]  ;;  %v228_v1 = vld [vmem:[%s824_s1 + $0x50] sm:$0xff]  ;;  %s191_s5 = scalar_select %p190_p10, %s650_s19, 1  ;;  %v227_v2 = vld [vmem:[%s824_s1 + $0x48] sm:$0xff]  ;;  %vm200_vm0 = vcmask 1046528   ;;  %vm207_vm1 = vcmask 1045504  }
  0x14   : > { %239 = vmatpush.msra.mxu0 %v229_v0  ;;  %v226_v3 = vld [vmem:[%s824_s1 + $0x40] sm:$0xff]  ;;  %v225_v6 = vld [vmem:[%s824_s1 + $0x38] sm:$0xff]  ;;  %v224_v9 = vld [vmem:[%s824_s1 + $0x30] sm:$0xff]  ;;  %vm214_vm2 = vcmask 261120   ;;  %vm216_vm3 = vcmask 523264   ;;  %vm231_vm4 = vcmask 785408   ;;  %p553_p11 = scmp.ne.s32.totalorder %s551_s23, %s552_s28 }
  0x15   : > { %s484_s8 = sshll.u32 %s191_s5, 4  ;;  %v223_v11 = vld [vmem:[%s824_s1 + $0x28] sm:$0xff]  ;;  %v222_v15 = vld [vmem:[%s824_s1 + $0x20] sm:$0xff]  ;;  %v221_v16 = vld [vmem:[%s824_s1 + $0x18] sm:$0xff]  ;;  %v602_v29 = vmov 32.0   ;;  %vm292_vm9 = vcmask 1040384  }
  0x16   : > { %240 = vmatpush.msra.mxu0 %v228_v1  ;;  %s194_s13 = scalar_lea.vmem %s823_s0, %s484_s8  ;;  %v220_v17 = vld [vmem:[%s824_s1 + $0x10] sm:$0xff]  ;;  %v219_v18 = vld [vmem:[%s824_s1 + $0x8] sm:$0xff]  ;;  %v218_v19 = vld [vmem:[%s824_s1] sm:$0xff]  ;;  %530 = vrcp.f32 %v602_v29  ;;  %vm402_vm13 = vcmask 57344   ;;  %p554_p12 = pnand %p553_p11, %p667_p5 }
  0x17   : > { %v195_v4 = vld [vmem:[%s194_s13] sm:$0xff]  ;;  %v196_v5 = vld [vmem:[%s194_s13 + $0x8] sm:$0x3]  ;;  %v317_v44 = vld [vmem:[%s825_s2 + $0x58] sm:$0xff]  ;;  %s189_s13 = scalar_lea.vmem [#allocation2], %s188_s9  ;;  %s556_s5 = scalar_lea.hbm %s827_s4, 2 }
  0x18   : > { %241 = vmatpush.msra.mxu0 %v227_v2  ;;  %v201_v7 = vrot.slane %v195_v4, 1  ;;  %v202_v8 = vrot.slane %v196_v5, 1  ;;  %v208_v12 = vrot.slane %v195_v4, 2  ;;  %v209_v13 = vrot.slane %v196_v5, 2  ;;  %v727_v24 = vld [vmem:[%s826_s3] sm:$0xff]  ;;  %v316_v45 = vld [vmem:[%s825_s2 + $0x50] sm:$0xff]  ;;  %326 = vmatpush.msra.mxu1 %v317_v44  ;;  %p555_p13 = pneg %p554_p12  ;;  %p558_p1 = scmp.lt.s32.totalorder %s556_s5, %s552_s28 }
  0x19   : > { %v230_v25 = vperm.slane %v727_v24, 0  ;;  %v315_v46 = vld [vmem:[%s825_s2 + $0x48] sm:$0xff]  ;;  %v314_v48 = vld [vmem:[%s825_s2 + $0x40] sm:$0xff]  ;;  %v313_v50 = vld [vmem:[%s825_s2 + $0x38] sm:$0xff]  ;;  %v284_v57 = vperm.slane %v727_v24, 1  ;;  %v286_v60 = vperm.slane %v727_v24, 2 }
  0x1a   : > { %242 = vmatpush.msra.mxu0 %v226_v3  ;;  %v203_v10 = vsel %vm200_vm0, %v201_v7, %v202_v8  ;;  %v210_v14 = vsel %vm207_vm1, %v208_v12, %v209_v13  ;;  %327 = vmatpush.msra.mxu1 %v316_v45  ;;  %v312_v52 = vld [vmem:[%s825_s2 + $0x30] sm:$0xff]  ;;  %v311_v54 = vld [vmem:[%s825_s2 + $0x28] sm:$0xff]  ;;  %v310_v2 = vld [vmem:[%s825_s2 + $0x20] sm:$0xff]  ;;  %v318_v13 = vperm.slane %v727_v24, 3  ;;  %s415_s14 = sshll.u32 %s189_s13, 4  ;;  %p559_p2 = por %p558_p1, %p557_p0  ;;  %s416_s14 = int_to_ptr.vmem [resolvable:$true] %s415_s14 }
  0x1b   : > { %204 = vrot.lane.b32.xlu0 %v203_v10, %s600_s27  ;;  %v309_v3 = vld [vmem:[%s825_s2 + $0x18] sm:$0xff]  ;;  %v307_v5 = vld [vmem:[%s825_s2 + $0x8] sm:$0xff] }
  0x1c   : > { %243 = vmatpush.msra.mxu0 %v225_v6  ;;  %v531_v30 = vpop.eup %530  ;;  %328 = vmatpush.msra.mxu1 %v315_v46  ;;  %v306_v6 = vld [vmem:[%s825_s2] sm:$0xff]  ;;  %p560_p3 = pnand %p559_p2, %p555_p13 }
  0x1d   : > { %v259_v31 = vmul.f32 32.0, %v531_v30  ;;  %vm263_vm5 = vweird.f32 %v531_v30 }
  0x1e   : > { %244 = vmatpush.msra.mxu0 %v224_v9  ;;  %329 = vmatpush.msra.mxu1 %v314_v48 }
  0x1f   : > { %v260_v32 = vsub.f32 1.0, %v259_v31 }
  0x20   : > { %245 = vmatpush.msra.mxu0 %v223_v11  ;;  %330 = vmatpush.msra.mxu1 %v313_v50 }
  0x21   : > { %v261_v33 = vmul.f32 %v531_v30, %v260_v32 }
  0x22   : > { %246 = vmatpush.msra.mxu0 %v222_v15  ;;  %331 = vmatpush.msra.mxu1 %v312_v52 }
  0x23   : > { %211 = vrot.lane.b32.xlu0 %v210_v14, %s601_s30  ;;  %v262_v34 = vadd.f32 %v531_v30, %v261_v33  ;;  %v364_v33 = vperm.slane %v727_v24, 4 }
  0x24   : > { %247 = vmatpush.msra.mxu0 %v221_v16  ;;  %332 = vmatpush.msra.mxu1 %v311_v54 }
  0x25   : > { %v731_v35 = vsel %vm263_vm5, %v531_v30, %v262_v34 }
  0x26   : > { %248 = vmatpush.msra.mxu0 %v220_v17  ;;  %333 = vmatpush.msra.mxu1 %v310_v2 }
  0x28   : > { %249 = vmatpush.msra.mxu0 %v219_v18  ;;  %334 = vmatpush.msra.mxu1 %v309_v3 }
  0x2a   : > { %250 = vmatpush.msra.mxu0 %v218_v19 }
  0x8d   : > { %v205_v20 = vpop.permute.xlu0 %204 }
  0x8e   : > { %v215_v21 = vsel %vm214_vm2, %v195_v4, %v205_v20  ;;  %v308_v4 = vld [vmem:[%s825_s2 + $0x10] sm:$0xff] }
  0x8f   : > { %335 = vmatpush.msra.mxu1 %v308_v4 }
  0x91   : > { %336 = vmatpush.msra.mxu1 %v307_v5 }
  0x93   : > { %337 = vmatpush.msra.mxu1 %v306_v6 }
  0x95   : > { %v212_v22 = vpop.permute.xlu0 %211 }
  0x96   : > { %v217_v23 = vsel %vm216_vm3, %v215_v21, %v212_v22 }
  0x97   : > { %478 = vmatmul.msk.f32.vlgmr.msra.gmra.mxu0 %vm231_vm4, %v217_v23 }
 0x114   : > { %v252_v26 = vpop.f32.mrf.mxu0 }
 0x115   : > { %v253_v27 = vadd.f32 %v252_v26, %v230_v25  ;;  %v603_v26 = vmov 0  }
 0x116   : > { %528 = vset.pattern.permute.xlu2 %v603_v26  ;;  %529 = vset.pattern.permute.xlu0 %v603_v26 }
 0x117   : > { %v255_v28 = vsel %vm214_vm2, %v253_v27, 0.0 }
 0x118   : > { %256 = vadd.xlane.f32.xlu1 %v255_v28 }
 0x18b   : > { %v257_v36 = vpop.xlane.xlu1 %256 }
 0x18c   : > { %v265_v37 = vmul.f32 %v731_v35, %v257_v36  ;;  %v366_v36 = vperm.slane %v727_v24, 5 }
 0x18e   : > { %v266_v38 = vsub.f32 %v253_v27, %v265_v37 }
 0x190   : > { %v267_v39 = vmul.f32 %v266_v38, %v266_v38 }
 0x192   : > { %v268_v40 = vsel %vm214_vm2, %v267_v39, 0.0 }
 0x193   : > { %269 = vadd.xlane.f32.xlu1 %v268_v40  ;;  %v373_v40 = vrot.slane %v727_v24, 6 }
 0x206   : > { %v270_v41 = vpop.xlane.xlu1 %269 }
 0x207   : > { %v271_v42 = vmul.f32 %v270_v41, %v731_v35 }
 0x209   : > { %v272_v43 = vadd.f32 1e-05, %v271_v42 }
 0x20b   : > { %532 = vrsqrt.f32 %v272_v43  ;;  %vm279_vm7 = vweird.f32 %v272_v43 }
 0x211   : > { %v533_v47 = vpop.eup %532 }
 0x212   : > { %v274_v49 = vmul.f32 %v533_v47, %v272_v43  ;;  %vm280_vm6 = vweird.f32 %v533_v47 }
 0x213   : > { %vm281_vm8 = vmor %vm279_vm7, %vm280_vm6 }
 0x214   : > { %v275_v51 = vmul.f32 %v533_v47, %v274_v49 }
 0x216   : > { %v276_v53 = vmul.f32 0.5, %v275_v51 }
 0x218   : > { %v277_v55 = vsub.f32 1.5, %v276_v53 }
 0x21a   : > { %v278_v56 = vmul.f32 %v533_v47, %v277_v55 }
 0x21c   : > { %v282_v58 = vsel %vm281_vm8, %v533_v47, %v278_v56 }
 0x21d   : > { %v283_v59 = vmul.f32 %v282_v58, %v266_v38 }
 0x21f   : > { %v285_v61 = vmul.f32 %v284_v57, %v283_v59 }
 0x221   : > { %v287_v62 = vadd.f32 %v286_v60, %v285_v61 }
 0x223   : > { %v288_v63 = vmax.f32 %v287_v62, 0.0 }
 0x225   : > { %297 = vrot.lane.b32.xlu2 %v288_v63, %s600_s27  ;;  %v294_v0 = vrot.slane %v288_v63, 1  ;;  %v290_v8 = vrot.slane %v288_v63, 7 }
 0x227   : > { %v296_v1 = vsel %vm200_vm0, %v294_v0, 0.0  ;;  %v293_v9 = vsel %vm292_vm9, 0.0, %v290_v8 }
 0x22d   : > { %301 = vrot.lane.b32.xlu2 %v296_v1, %s601_s30 }
 0x235   : > { %371 = vperm.xlu2 %528, %v727_v24  }
 0x27f   : > { %v298_v7 = vpop.permute.xlu2 %297 }
 0x280   : > { %v304_v10 = vsel %vm214_vm2, %v293_v9, %v298_v7 }
 0x287   : > { %v302_v11 = vpop.permute.xlu2 %301 }
 0x288   : > { %v305_v12 = vsel %vm216_vm3, %v304_v10, %v302_v11 }
 0x289   : > { %479 = vmatmul.msk.f32.vlgmr.msra.gmra.mxu1 %vm231_vm4, %v305_v12 }
 0x28f   : > { %v372_v41 = vpop.permute.xlu2 %371 }
 0x290   : > { %v374_v42 = vrot.slane %v372_v41, 7 }
 0x306   : > { %v339_v14 = vpop.f32.mrf.mxu1 }
 0x307   : > { %v340_v15 = vadd.f32 %v339_v14, %v318_v13 }
 0x309   : > { %v342_v16 = vsel %vm214_vm2, %v340_v15, 0.0 }
 0x30a   : > { %343 = vadd.xlane.f32.xlu0 %v342_v16 }
 0x37d   : > { %v344_v17 = vpop.xlane.xlu0 %343 }
 0x37e   : > { %v345_v18 = vmul.f32 %v344_v17, %v731_v35 }
 0x380   : > { %v346_v19 = vsub.f32 %v340_v15, %v345_v18 }
 0x382   : > { %v347_v20 = vmul.f32 %v346_v19, %v346_v19 }
 0x384   : > { %v348_v21 = vsel %vm214_vm2, %v347_v20, 0.0 }
 0x385   : > { %349 = vadd.xlane.f32.xlu1 %v348_v21 }
 0x3f8   : > { %v350_v22 = vpop.xlane.xlu1 %349 }
 0x3f9   : > { %v351_v23 = vmul.f32 %v350_v22, %v731_v35 }
 0x3fb   : > { %v352_v25 = vadd.f32 1e-05, %v351_v23 }
 0x3fd   : > { %534 = vrsqrt.f32 %v352_v25  ;;  %vm359_vm11 = vweird.f32 %v352_v25 }
 0x403   : > { %v535_v27 = vpop.eup %534 }
 0x404   : > { %v354_v28 = vmul.f32 %v535_v27, %v352_v25  ;;  %vm360_vm10 = vweird.f32 %v535_v27 }
 0x405   : > { %vm361_vm12 = vmor %vm359_vm11, %vm360_vm10 }
 0x406   : > { %v355_v29 = vmul.f32 %v535_v27, %v354_v28 }
 0x408   : > { %v356_v30 = vmul.f32 0.5, %v355_v29 }
 0x40a   : > { %v357_v31 = vsub.f32 1.5, %v356_v30 }
 0x40c   : > { %v358_v32 = vmul.f32 %v535_v27, %v357_v31 }
 0x40e   : > { %v362_v34 = vsel %vm361_vm12, %v535_v27, %v358_v32 }
 0x40f   : > { %v363_v35 = vmul.f32 %v362_v34, %v346_v19 }
 0x411   : > { %v365_v37 = vmul.f32 %v364_v33, %v363_v35 }
 0x413   : > { %v367_v38 = vadd.f32 %v366_v36, %v365_v37 }
 0x415   : > { %v368_v39 = vmax.f32 %v367_v38, 0.0 }
 0x417   : > { %480 = vmatpush.xpose.msk.msra.mxu2 %vm214_vm2, %v368_v39 }
 0x41a   : > { %481 = vmatmul.msk.f32.vlgmr.msra.gmra.mxu2 %vm214_vm2, %v373_v40 }
 0x49d   : > { %v398_v43 = vpop.f32.mrf.mxu2 }
 0x49e   : > { %v399_v44 = vadd.f32 %v398_v43, %v374_v42 }
 0x4a0   : > { %v401_v45 = vmax.f32 %v399_v44, 0.0 }
 0x4a2   : > { %403 = vst.msk [vmem:[%s189_s13] sm:$0x1] %vm402_vm13, %v401_v45 }
 0x4a3   : > { %563 = shalt.err (!%p560_p3)
}
 0x4a4   : > { %485 = dma.vmem_to_hbm [thread:$0]  (%p667_p5), %s416_s14, 16, %s418_s20, %s405_s22  }
 0x4a5 PF: > { %p491_p4 = scmp.ge.s32.totalorder %s598_s18, 2  ;;  %s429_s7 = sand.u32 1, %s586_s15  }
 0x4a6   : > { %s430_s30 = scalar_lea.sflag [#allocation3], %s429_s7 }
 0x4a7   : > { %p488_p7 = pnand %p491_p4, %p671_p6 }
 0x4a9   : > { %p489_p8 = pneg %p488_p7 }
 0x4ab   : > { %581 = dma.done.wait (%p489_p8), %s430_s30, 16  }
 0x4ac   : > { %583 = vsyncadd (%p489_p8), %s430_s30, 4294967280  ;;  %p14_p9 = scmp.ge.s32.totalorder %s654_s21, 4   ;;  %s830_s15 = smov %s590_s16 }
 0x4ad   : > { %s831_s16 = smov %s594_s17  ;;  %s832_s17 = smov %s665_s24 }
 0x4ae   : > { %s833_s18 = smov %s654_s21  ;;  %16 = sbr.rel (!%p14_p9) target bundleno = 3 (0x3), region = 71 }
 0x4b3   :  { %435 = vsyncpa [#allocation3], 1 }
 0x4b4   :  { %437 = vsyncpa [#allocation3 + $0x1], 1 }

</bundles_post_ra>
